<compile_context>
chip_gen: v5e
topology: v5e:2x2
jax: 0.10.0
libtpu: 0.0.40
codegen_flags: <defaults>
</compile_context>

<pallas_src>
import math
import functools

import jax
import jax.numpy as jnp
from jax.experimental import pallas as pl
from jax.experimental.pallas import tpu as pltpu


# ---------------------------------------------------------------------------
# helpers
# ---------------------------------------------------------------------------
def _pick_tile(dim, target):
    """Largest divisor of `dim` that is a multiple of 8 and <= target (else full dim)."""
    if dim <= target:
        return dim
    t = (target // 8) * 8
    while t >= 8:
        if dim % t == 0:
            return t
        t -= 8
    return dim


def _augment_out(p):
    """[B, M, 3] -> [B, M, 5] rows = [x, y, z, |p|^2, 1]."""
    sq = jnp.sum(p * p, axis=-1, keepdims=True)
    return jnp.concatenate([p, sq, jnp.ones_like(sq)], axis=-1)


def _augment_in(q):
    """[B, N, 3] -> [B, N, 5] rows = [-2x, -2y, -2z, 1, |q|^2]."""
    sq = jnp.sum(q * q, axis=-1, keepdims=True)
    return jnp.concatenate([-2.0 * q, jnp.ones_like(sq), sq], axis=-1)


# ---------------------------------------------------------------------------
# fused level kernel:
#   MC conv (KDE weighted, radius masked mean @ W_conv) -> BN+ReLU -> 1x1 -> BN+ReLU
# grid = (batch, out-point tiles, in-point tiles)   [reduction axis last]
# ---------------------------------------------------------------------------
def _fused_level_kernel(oa_ref, ia_ref, f_ref, wc_ref, g1_ref, b1_ref,
                        w1_ref, wb1_ref, g2_ref, b2_ref, o_ref,
                        num_acc, den_acc, *, inv2s2, r2, apply_radius):
    n = pl.program_id(2)

    @pl.when(n == 0)
    def _():
        num_acc[...] = jnp.zeros_like(num_acc)
        den_acc[...] = jnp.zeros_like(den_acc)

    # pairwise squared distances in ONE MXU matmul (augmented coordinates)
    d2 = jax.lax.dot_general(oa_ref[...], ia_ref[...],
                             (((1,), (1,)), ((), ())),
                             preferred_element_type=jnp.float32)          # [TM, TN]
    w = jnp.exp(d2 * (-inv2s2))                                           # EUP exp
    if apply_radius:
        w = jnp.where(d2 <= r2, w, 0.0)

    # deferred KDE normalisation: accumulate unnormalised numerator + denominator
    den_acc[...] += jnp.sum(w, axis=1, keepdims=True)                     # [TM, 1]
    num_acc[...] += jnp.dot(w.astype(jnp.bfloat16),
                            f_ref[...].astype(jnp.bfloat16),
                            preferred_element_type=jnp.float32)           # [TM, Cin]

    @pl.when(n == pl.num_programs(2) - 1)
    def _():
        inv = pl.reciprocal(den_acc[...] + 1e-8, approx=True)             # [TM, 1]
        agg = num_acc[...] * inv                                          # KDE mean
        h = jnp.dot(agg, wc_ref[...], preferred_element_type=jnp.float32)  # MC conv map
        h = jnp.maximum(h * g1_ref[...] + b1_ref[...], 0.0)               # BN + ReLU
        h = jnp.dot(h, w1_ref[...], preferred_element_type=jnp.float32) + wb1_ref[...]
        o_ref[...] = jnp.maximum(h * g2_ref[...] + b2_ref[...], 0.0)      # BN + ReLU


def mc_level(out_pts, in_pts, feats, w_conv, bn_a, w_1x1, b_1x1, bn_b,
             *, radius, kde_window, apply_radius=True,
             tm_target=256, tn_target=1024):
    B, Mp, _ = out_pts.shape
    _, Np, cin = feats.shape
    cout = w_1x1.shape[1]
    TM = _pick_tile(Mp, tm_target)
    TN = _pick_tile(Np, tn_target)

    oa = _augment_out(out_pts)
    ia = _augment_in(in_pts)
    sigma = float(kde_window * radius)
    inv2s2 = 1.0 / (2.0 * sigma * sigma)
    r2 = float(radius * radius)

    kernel = functools.partial(_fused_level_kernel, inv2s2=inv2s2, r2=r2,
                               apply_radius=apply_radius)
    grid = (B, Mp // TM, Np // TN)

    def p2d(shape):
        return pl.BlockSpec(shape, lambda b, i, n: (0, 0))

    return pl.pallas_call(
        kernel,
        grid=grid,
        in_specs=[
            pl.BlockSpec((None, TM, 5), lambda b, i, n: (b, i, 0)),
            pl.BlockSpec((None, TN, 5), lambda b, i, n: (b, n, 0)),
            pl.BlockSpec((None, TN, cin), lambda b, i, n: (b, n, 0)),
            p2d(w_conv.shape),
            p2d(bn_a[0].shape), p2d(bn_a[1].shape),
            p2d(w_1x1.shape), p2d(b_1x1.shape),
            p2d(bn_b[0].shape), p2d(bn_b[1].shape),
        ],
        out_specs=pl.BlockSpec((None, TM, cout), lambda b, i, n: (b, i, 0)),
        out_shape=jax.ShapeDtypeStruct((B, Mp, cout), jnp.float32),
        scratch_shapes=[pltpu.VMEM((TM, cin), jnp.float32),
                        pltpu.VMEM((TM, 1), jnp.float32)],
        compiler_params=pltpu.CompilerParams(
            dimension_semantics=("parallel", "parallel", "arbitrary"),
            vmem_limit_bytes=32 * 1024 * 1024),
    )(oa, ia, feats, w_conv, bn_a[0], bn_a[1], w_1x1, b_1x1, bn_b[0], bn_b[1])


# ---------------------------------------------------------------------------
# fused head kernel: MC conv3 (global radius -> no radius mask) -> BN+ReLU -> MLP2Hidden
# grid = (batch, in-point tiles)
# ---------------------------------------------------------------------------
def _fused_head_kernel(oa_ref, ia_ref, f_ref, wc_ref, gf_ref, bf_ref,
                       w1_ref, b1_ref, g1_ref, a1_ref,
                       w2_ref, b2_ref, g2_ref, a2_ref,
                       w3_ref, b3_ref, o_ref,
                       num_acc, den_acc, *, inv2s2):
    n = pl.program_id(1)

    @pl.when(n == 0)
    def _():
        num_acc[...] = jnp.zeros_like(num_acc)
        den_acc[...] = jnp.zeros_like(den_acc)

    d2 = jax.lax.dot_general(oa_ref[...], ia_ref[...],
                             (((1,), (1,)), ((), ())),
                             preferred_element_type=jnp.float32)          # [1, TN]
    # conv3 radius (sqrt(3)+0.1) covers the whole unit cube -> radius mask dropped.
    w = jnp.exp(d2 * (-inv2s2))
    den_acc[...] += jnp.sum(w, axis=1, keepdims=True)
    num_acc[...] += jnp.dot(w.astype(jnp.bfloat16),
                            f_ref[...].astype(jnp.bfloat16),
                            preferred_element_type=jnp.float32)           # [1, Cin]

    @pl.when(n == pl.num_programs(1) - 1)
    def _():
        inv = pl.reciprocal(den_acc[...] + 1e-8, approx=True)
        x = num_acc[...] * inv                                            # KDE mean
        x = jnp.dot(x, wc_ref[...], preferred_element_type=jnp.float32)   # conv3 map
        x = jnp.maximum(x * gf_ref[...] + bf_ref[...], 0.0)               # final BN+ReLU
        # MLP2Hidden (dropout == identity, deterministic inference)
        x = jnp.dot(x, w1_ref[...], preferred_element_type=jnp.float32) + b1_ref[...]
        x = jnp.maximum(x * g1_ref[...] + a1_ref[...], 0.0)
        x = jnp.dot(x, w2_ref[...], preferred_element_type=jnp.float32) + b2_ref[...]
        x = jnp.maximum(x * g2_ref[...] + a2_ref[...], 0.0)
        o_ref[...] = (jnp.dot(x, w3_ref[...], preferred_element_type=jnp.float32)
                      + b3_ref[...])


def mc_head(out_pts, in_pts, feats, w_conv, bn_f, mlp_l1, mlp_bn1,
            mlp_l2, mlp_bn2, mlp_l3, *, radius, kde_window, tn_target=1024):
    B, Np, cin = feats.shape
    ncat = mlp_l3[0].shape[1]
    TN = _pick_tile(Np, tn_target)

    oa = _augment_out(out_pts)          # [B, 1, 5]
    ia = _augment_in(in_pts)            # [B, Np, 5]
    sigma = float(kde_window * radius)
    inv2s2 = 1.0 / (2.0 * sigma * sigma)

    kernel = functools.partial(_fused_head_kernel, inv2s2=inv2s2)
    grid = (B, Np // TN)

    def p2d(shape):
        return pl.BlockSpec(shape, lambda b, n: (0, 0))

    logits = pl.pallas_call(
        kernel,
        grid=grid,
        in_specs=[
            pl.BlockSpec((None, 1, 5), lambda b, n: (b, 0, 0)),
            pl.BlockSpec((None, TN, 5), lambda b, n: (b, n, 0)),
            pl.BlockSpec((None, TN, cin), lambda b, n: (b, n, 0)),
            p2d(w_conv.shape),
            p2d(bn_f[0].shape), p2d(bn_f[1].shape),
            p2d(mlp_l1[0].shape), p2d(mlp_l1[1].shape),
            p2d(mlp_bn1[0].shape), p2d(mlp_bn1[1].shape),
            p2d(mlp_l2[0].shape), p2d(mlp_l2[1].shape),
            p2d(mlp_bn2[0].shape), p2d(mlp_bn2[1].shape),
            p2d(mlp_l3[0].shape), p2d(mlp_l3[1].shape),
        ],
        out_specs=pl.BlockSpec((None, 1, ncat), lambda b, n: (b, 0, 0)),
        out_shape=jax.ShapeDtypeStruct((B, 1, ncat), jnp.float32),
        scratch_shapes=[pltpu.VMEM((1, cin), jnp.float32),
                        pltpu.VMEM((1, 1), jnp.float32)],
        compiler_params=pltpu.CompilerParams(
            dimension_semantics=("parallel", "arbitrary"),
            vmem_limit_bytes=32 * 1024 * 1024),
    )(oa, ia, feats, w_conv, bn_f[0], bn_f[1],
      mlp_l1[0], mlp_l1[1], mlp_bn1[0], mlp_bn1[1],
      mlp_l2[0], mlp_l2[1], mlp_bn2[0], mlp_bn2[1],
      mlp_l3[0], mlp_l3[1])
    return logits.reshape(B, ncat)


# ---------------------------------------------------------------------------
# parameter init (deterministic, synthetic)
# ---------------------------------------------------------------------------
def init_linear(key, cin, cout):
    kw, kb = jax.random.split(key)
    w = jax.random.normal(kw, (cin, cout), jnp.float32) * (1.0 / math.sqrt(cin))
    b = jax.random.normal(kb, (1, cout), jnp.float32) * 0.01
    return w, b


def init_bn(cfeat):
    return jnp.ones((1, cfeat), jnp.float32), jnp.zeros((1, cfeat), jnp.float32)


# ---------------------------------------------------------------------------
# full MCClassS forward (3 fused pallas_calls)
# ---------------------------------------------------------------------------
def mcclass_s_forward(points, batch_ids, features, params, k, batch_size):
    # batch_size is static (module constructor arg) -> no device-to-host sync.
    # Points/features are batch-contiguous with equal per-sample counts, so the batch
    # mask is realised as a batch grid axis (block-diagonal structure, no compares).
    # TODO(synk): MCCNN's Poisson-disk PointHierarchy can yield ragged per-sample
    # counts; that case would need an explicit batch-id mask path instead of reshape.
    del batch_ids
    nif = features.shape[-1]
    B = batch_size
    pts0 = points.reshape(B, -1, 3)
    f0 = features.reshape(B, -1, nif)

    # ---- point hierarchy (deterministic strided sub-sampling) ----
    pts1 = pts0[:, ::2]                            # level 1
    pts2 = pts1[:, ::4]                            # level 2
    pts3 = jnp.mean(pts2, axis=1, keepdims=True)   # level 3: per-sample centroid

    p = params

    # conv1 -> bn1 -> conv1x1_1 -> bn2           (level0 -> level1, radius 0.2)
    f1 = mc_level(pts1, pts0, f0, p["w_conv1"], p["bn1"], *p["conv1x1_1"], p["bn2"],
                  radius=0.2, kde_window=0.2)
    # conv2 -> bn2 (shared, as in reference) -> conv1x1_2 -> bn3   (radius 0.8)
    f2 = mc_level(pts2, pts1, f1, p["w_conv2"], p["bn2"], *p["conv1x1_2"], p["bn3"],
                  radius=0.8, kde_window=0.2)
    # conv3 -> final bn -> MLP2Hidden            (radius sqrt(3)+0.1, global)
    logits = mc_head(pts3, pts2, f2, p["w_conv3"], p["bn_final"],
                     p["mlp_l1"], p["mlp_bn1"], p["mlp_l2"], p["mlp_bn2"], p["mlp_l3"],
                     radius=math.sqrt(3.0) + 0.1, kde_window=0.2)
    return logits


# ---------------------------------------------------------------------------
if __name__ == "__main__":
    key = jax.random.PRNGKey(0)
    B = 2            # batch_size
    PTS = 32         # points per sample
    NIF = 4          # numInputFeatures
    K = 8            # k
    NCAT = 4         # numOutCat

    keys = jax.random.split(key, 16)

    points = jax.random.uniform(keys[0], (B * PTS, 3), dtype=jnp.float32)
    features = jax.random.uniform(keys[1], (B * PTS, NIF), dtype=jnp.float32)
    batch_ids = jnp.repeat(jnp.arange(B, dtype=jnp.int32), PTS)

    params = {
        "w_conv1": jax.random.normal(keys[2], (NIF, K), jnp.float32) / math.sqrt(NIF),
        "bn1": init_bn(K),
        "conv1x1_1": init_linear(keys[3], K, 2 * K),
        "bn2": init_bn(2 * K),
        "w_conv2": jax.random.normal(keys[4], (2 * K, 2 * K), jnp.float32) / math.sqrt(2 * K),
        "conv1x1_2": init_linear(keys[5], 2 * K, 4 * K),
        "bn3": init_bn(4 * K),
        "w_conv3": jax.random.normal(keys[6], (4 * K, 4 * K), jnp.float32) / math.sqrt(4 * K),
        "bn_final": init_bn(4 * K),
        "mlp_l1": init_linear(keys[7], 4 * K, 2 * K),
        "mlp_bn1": init_bn(2 * K),
        "mlp_l2": init_linear(keys[8], 2 * K, K),
        "mlp_bn2": init_bn(K),
        "mlp_l3": init_linear(keys[9], K, NCAT),
    }

    logits = mcclass_s_forward(points, batch_ids, features, params, K, batch_size=B)
    logits = jax.block_until_ready(logits)

    assert logits.shape == (B, NCAT), logits.shape
    assert bool(jnp.all(jnp.isfinite(logits)))
    print("KERNEL_OK")
</pallas_src>

<mosaic_0001>
module attributes {stable_mosaic.version = 11 : i64} {
  func.func @_fused_level_kernel(%arg0: i32, %arg1: i32, %arg2: i32, %arg3: memref<1x16x5xf32, #tpu.memory_space<vmem>>, %arg4: memref<1x32x5xf32, #tpu.memory_space<vmem>>, %arg5: memref<1x32x4xf32, #tpu.memory_space<vmem>>, %arg6: memref<4x8xf32, #tpu.memory_space<vmem>>, %arg7: memref<1x8xf32, #tpu.memory_space<vmem>>, %arg8: memref<1x8xf32, #tpu.memory_space<vmem>>, %arg9: memref<8x16xf32, #tpu.memory_space<vmem>>, %arg10: memref<1x16xf32, #tpu.memory_space<vmem>>, %arg11: memref<1x16xf32, #tpu.memory_space<vmem>>, %arg12: memref<1x16xf32, #tpu.memory_space<vmem>>, %arg13: memref<1x16x16xf32, #tpu.memory_space<vmem>>, %arg14: memref<16x4xf32, #tpu.memory_space<vmem>>, %arg15: memref<16x1xf32, #tpu.memory_space<vmem>>) attributes {dimension_semantics = [#tpu.dimension_semantics<parallel>, #tpu.dimension_semantics<parallel>, #tpu.dimension_semantics<arbitrary>], iteration_bounds = array<i64: 2, 1, 1>, scalar_prefetch = 0 : i64, scratch_operands = 2 : i64, tpu.core_type = #tpu.core_type<tc>, window_params = [{transform_indices = @transform_0, window_bounds = array<i64: 1, 16, 5>}, {transform_indices = @transform_1, window_bounds = array<i64: 1, 32, 5>}, {transform_indices = @transform_2, window_bounds = array<i64: 1, 32, 4>}, {pipeline_mode = #tpu.pipeline_mode<synchronous>, transform_indices = @transform_3, window_bounds = array<i64: 4, 8>}, {pipeline_mode = #tpu.pipeline_mode<synchronous>, transform_indices = @transform_4, window_bounds = array<i64: 1, 8>}, {pipeline_mode = #tpu.pipeline_mode<synchronous>, transform_indices = @transform_5, window_bounds = array<i64: 1, 8>}, {pipeline_mode = #tpu.pipeline_mode<synchronous>, transform_indices = @transform_6, window_bounds = array<i64: 8, 16>}, {pipeline_mode = #tpu.pipeline_mode<synchronous>, transform_indices = @transform_7, window_bounds = array<i64: 1, 16>}, {pipeline_mode = #tpu.pipeline_mode<synchronous>, transform_indices = @transform_8, window_bounds = array<i64: 1, 16>}, {pipeline_mode = #tpu.pipeline_mode<synchronous>, transform_indices = @transform_9, window_bounds = array<i64: 1, 16>}, {transform_indices = @transform_10, window_bounds = array<i64: 1, 16, 16>}]} {
    %c0_i32 = arith.constant 0 : i32
    %0 = arith.cmpi eq, %arg2, %c0_i32 : i32
    %1 = arith.extui %0 : i1 to i32
    %c0_i32_0 = arith.constant 0 : i32
    %2 = arith.cmpi ne, %1, %c0_i32_0 : i32
    scf.if %2 {
      %cst_24 = arith.constant 0.000000e+00 : f32
      %31 = vector.broadcast %cst_24 : f32 to vector<16x4xf32>
      %c0_25 = arith.constant 0 : index
      %c0_26 = arith.constant 0 : index
      %32 = vector.load %arg14[%c0_25, %c0_26] : memref<16x4xf32, #tpu.memory_space<vmem>>, vector<16x4xf32>
      tpu.vector_store %arg14[%c0_25, %c0_26], %31 {strides = array<i32>} : memref<16x4xf32, #tpu.memory_space<vmem>>, vector<16x4xf32>,
      %cst_27 = arith.constant 0.000000e+00 : f32
      %33 = vector.broadcast %cst_27 : f32 to vector<16x1xf32>
      %c0_28 = arith.constant 0 : index
      %c0_29 = arith.constant 0 : index
      %34 = vector.load %arg15[%c0_28, %c0_29] : memref<16x1xf32, #tpu.memory_space<vmem>>, vector<16x1xf32>
      tpu.vector_store %arg15[%c0_28, %c0_29], %33 {strides = array<i32>} : memref<16x1xf32, #tpu.memory_space<vmem>>, vector<16x1xf32>,
    } else {
    }
    %c0 = arith.constant 0 : index
    %c0_1 = arith.constant 0 : index
    %c0_2 = arith.constant 0 : index
    %3 = vector.load %arg3[%c0, %c0_1, %c0_2] : memref<1x16x5xf32, #tpu.memory_space<vmem>>, vector<1x16x5xf32>
    %4 = vector.shape_cast %3 : vector<1x16x5xf32> to vector<16x5xf32>
    %c0_3 = arith.constant 0 : index
    %c0_4 = arith.constant 0 : index
    %c0_5 = arith.constant 0 : index
    %5 = vector.load %arg4[%c0_3, %c0_4, %c0_5] : memref<1x32x5xf32, #tpu.memory_space<vmem>>, vector<1x32x5xf32>
    %6 = vector.shape_cast %5 : vector<1x32x5xf32> to vector<32x5xf32>
    %cst = arith.constant dense<0.000000e+00> : vector<16x32xf32>
    %7 = tpu.matmul %4, %6, %cst {dimension_numbers = #tpu.dot_dimension_numbers<[1], [1], [0], [0], [0, 0, 1, 0], [], []>} : vector<16x5xf32>, vector<32x5xf32>, vector<16x32xf32> -> vector<16x32xf32>
    %cst_6 = arith.constant -3.125000e+02 : f32
    %8 = vector.broadcast %cst_6 : f32 to vector<16x32xf32>
    %9 = arith.mulf %7, %8 : vector<16x32xf32>
    %10 = math.exp %9 : vector<16x32xf32>
    %cst_7 = arith.constant 4.000000e-02 : f32
    %11 = vector.broadcast %cst_7 : f32 to vector<16x32xf32>
    %12 = arith.cmpf ole, %7, %11 : vector<16x32xf32>
    %cst_8 = arith.constant 0.000000e+00 : f32
    %13 = vector.broadcast %cst_8 : f32 to vector<16x32xf32>
    %14 = arith.select %12, %10, %13 : vector<16x32xi1>, vector<16x32xf32>
    %c0_9 = arith.constant 0 : index
    %c0_10 = arith.constant 0 : index
    %15 = vector.load %arg15[%c0_9, %c0_10] : memref<16x1xf32, #tpu.memory_space<vmem>>, vector<16x1xf32>
    %cst_11 = arith.constant dense<0.000000e+00> : vector<16xf32>
    %16 = vector.multi_reduction <add>, %14, %cst_11 [1] : vector<16x32xf32> to vector<16xf32>
    %17 = vector.shape_cast %16 : vector<16xf32> to vector<16x1xf32>
    %18 = arith.addf %15, %17 : vector<16x1xf32>
    %c0_12 = arith.constant 0 : index
    %c0_13 = arith.constant 0 : index
    %19 = vector.load %arg15[%c0_12, %c0_13] : memref<16x1xf32, #tpu.memory_space<vmem>>, vector<16x1xf32>
    tpu.vector_store %arg15[%c0_12, %c0_13], %18 {strides = array<i32>} : memref<16x1xf32, #tpu.memory_space<vmem>>, vector<16x1xf32>,
    %c0_14 = arith.constant 0 : index
    %c0_15 = arith.constant 0 : index
    %20 = vector.load %arg14[%c0_14, %c0_15] : memref<16x4xf32, #tpu.memory_space<vmem>>, vector<16x4xf32>
    %21 = arith.truncf %14 : vector<16x32xf32> to vector<16x32xbf16>
    %c0_16 = arith.constant 0 : index
    %c0_17 = arith.constant 0 : index
    %c0_18 = arith.constant 0 : index
    %22 = vector.load %arg5[%c0_16, %c0_17, %c0_18] : memref<1x32x4xf32, #tpu.memory_space<vmem>>, vector<1x32x4xf32>
    %23 = vector.shape_cast %22 : vector<1x32x4xf32> to vector<32x4xf32>
    %24 = arith.truncf %23 : vector<32x4xf32> to vector<32x4xbf16>
    %cst_19 = arith.constant dense<0.000000e+00> : vector<16x4xf32>
    %25 = tpu.matmul %21, %24, %cst_19 {dimension_numbers = #tpu.dot_dimension_numbers<[1], [0], [0], [1], [0, 0, 1, 1], [], []>} : vector<16x32xbf16>, vector<32x4xbf16>, vector<16x4xf32> -> vector<16x4xf32>
    %26 = arith.addf %20, %25 : vector<16x4xf32>
    %c0_20 = arith.constant 0 : index
    %c0_21 = arith.constant 0 : index
    %27 = vector.load %arg14[%c0_20, %c0_21] : memref<16x4xf32, #tpu.memory_space<vmem>>, vector<16x4xf32>
    tpu.vector_store %arg14[%c0_20, %c0_21], %26 {strides = array<i32>} : memref<16x4xf32, #tpu.memory_space<vmem>>, vector<16x4xf32>,
    %c0_i32_22 = arith.constant 0 : i32
    %28 = arith.cmpi eq, %arg2, %c0_i32_22 : i32
    %29 = arith.extui %28 : i1 to i32
    %c0_i32_23 = arith.constant 0 : i32
    %30 = arith.cmpi ne, %29, %c0_i32_23 : i32
    scf.if %30 {
      %c0_24 = arith.constant 0 : index
      %c0_25 = arith.constant 0 : index
      %31 = vector.load %arg15[%c0_24, %c0_25] : memref<16x1xf32, #tpu.memory_space<vmem>>, vector<16x1xf32>
      %cst_26 = arith.constant 9.99999993E-9 : f32
      %32 = vector.broadcast %cst_26 : f32 to vector<16x1xf32>
      %33 = arith.addf %31, %32 : vector<16x1xf32>
      %34 = tpu.reciprocal %33 {approx = true} : vector<16x1xf32> -> vector<16x1xf32>
      %c0_27 = arith.constant 0 : index
      %c0_28 = arith.constant 0 : index
      %35 = vector.load %arg14[%c0_27, %c0_28] : memref<16x4xf32, #tpu.memory_space<vmem>>, vector<16x4xf32>
      %36 = vector.broadcast %34 : vector<16x1xf32> to vector<16x4xf32>
      %37 = arith.mulf %35, %36 : vector<16x4xf32>
      %c0_29 = arith.constant 0 : index
      %c0_30 = arith.constant 0 : index
      %38 = vector.load %arg6[%c0_29, %c0_30] : memref<4x8xf32, #tpu.memory_space<vmem>>, vector<4x8xf32>
      %cst_31 = arith.constant dense<0.000000e+00> : vector<16x8xf32>
      %39 = tpu.matmul %37, %38, %cst_31 {dimension_numbers = #tpu.dot_dimension_numbers<[1], [0], [0], [1], [0, 0, 1, 1], [], []>} : vector<16x4xf32>, vector<4x8xf32>, vector<16x8xf32> -> vector<16x8xf32>
      %c0_32 = arith.constant 0 : index
      %c0_33 = arith.constant 0 : index
      %40 = vector.load %arg7[%c0_32, %c0_33] : memref<1x8xf32, #tpu.memory_space<vmem>>, vector<1x8xf32>
      %41 = vector.broadcast %40 : vector<1x8xf32> to vector<16x8xf32>
      %42 = arith.mulf %39, %41 : vector<16x8xf32>
      %c0_34 = arith.constant 0 : index
      %c0_35 = arith.constant 0 : index
      %43 = vector.load %arg8[%c0_34, %c0_35] : memref<1x8xf32, #tpu.memory_space<vmem>>, vector<1x8xf32>
      %44 = vector.broadcast %43 : vector<1x8xf32> to vector<16x8xf32>
      %45 = arith.addf %42, %44 : vector<16x8xf32>
      %cst_36 = arith.constant 0.000000e+00 : f32
      %46 = vector.broadcast %cst_36 : f32 to vector<16x8xf32>
      %47 = arith.maximumf %45, %46 : vector<16x8xf32>
      %c0_37 = arith.constant 0 : index
      %c0_38 = arith.constant 0 : index
      %48 = vector.load %arg9[%c0_37, %c0_38] : memref<8x16xf32, #tpu.memory_space<vmem>>, vector<8x16xf32>
      %cst_39 = arith.constant dense<0.000000e+00> : vector<16x16xf32>
      %49 = tpu.matmul %47, %48, %cst_39 {dimension_numbers = #tpu.dot_dimension_numbers<[1], [0], [0], [1], [0, 0, 1, 1], [], []>} : vector<16x8xf32>, vector<8x16xf32>, vector<16x16xf32> -> vector<16x16xf32>
      %c0_40 = arith.constant 0 : index
      %c0_41 = arith.constant 0 : index
      %50 = vector.load %arg10[%c0_40, %c0_41] : memref<1x16xf32, #tpu.memory_space<vmem>>, vector<1x16xf32>
      %51 = vector.broadcast %50 : vector<1x16xf32> to vector<16x16xf32>
      %52 = arith.addf %49, %51 : vector<16x16xf32>
      %c0_42 = arith.constant 0 : index
      %c0_43 = arith.constant 0 : index
      %53 = vector.load %arg11[%c0_42, %c0_43] : memref<1x16xf32, #tpu.memory_space<vmem>>, vector<1x16xf32>
      %54 = vector.broadcast %53 : vector<1x16xf32> to vector<16x16xf32>
      %55 = arith.mulf %52, %54 : vector<16x16xf32>
      %c0_44 = arith.constant 0 : index
      %c0_45 = arith.constant 0 : index
      %56 = vector.load %arg12[%c0_44, %c0_45] : memref<1x16xf32, #tpu.memory_space<vmem>>, vector<1x16xf32>
      %57 = vector.broadcast %56 : vector<1x16xf32> to vector<16x16xf32>
      %58 = arith.addf %55, %57 : vector<16x16xf32>
      %cst_46 = arith.constant 0.000000e+00 : f32
      %59 = vector.broadcast %cst_46 : f32 to vector<16x16xf32>
      %60 = arith.maximumf %58, %59 : vector<16x16xf32>
      %c0_47 = arith.constant 0 : index
      %c0_48 = arith.constant 0 : index
      %c0_49 = arith.constant 0 : index
      %61 = vector.load %arg13[%c0_47, %c0_48, %c0_49] : memref<1x16x16xf32, #tpu.memory_space<vmem>>, vector<1x16x16xf32>
      %62 = vector.shape_cast %61 : vector<1x16x16xf32> to vector<16x16xf32>
      %63 = vector.shape_cast %60 : vector<16x16xf32> to vector<1x16x16xf32>
      tpu.vector_store %arg13[%c0_47, %c0_48, %c0_49], %63 {strides = array<i32>} : memref<1x16x16xf32, #tpu.memory_space<vmem>>, vector<1x16x16xf32>,
    } else {
    }
    return
  }
  func.func @transform_0(%arg0: i32, %arg1: i32, %arg2: i32) -> (i32, i32, i32) {
    %c0_i32 = arith.constant 0 : i32
    %c0_i32_0 = arith.constant 0 : i32
    return %arg0, %arg1, %c0_i32 : i32, i32, i32
  }
  func.func @transform_1(%arg0: i32, %arg1: i32, %arg2: i32) -> (i32, i32, i32) {
    %c0_i32 = arith.constant 0 : i32
    %c0_i32_0 = arith.constant 0 : i32
    return %arg0, %arg2, %c0_i32 : i32, i32, i32
  }
  func.func @transform_2(%arg0: i32, %arg1: i32, %arg2: i32) -> (i32, i32, i32) {
    %c0_i32 = arith.constant 0 : i32
    %c0_i32_0 = arith.constant 0 : i32
    return %arg0, %arg2, %c0_i32 : i32, i32, i32
  }
  func.func @transform_3(%arg0: i32, %arg1: i32, %arg2: i32) -> (i32, i32) {
    %c0_i32 = arith.constant 0 : i32
    %c0_i32_0 = arith.constant 0 : i32
    %c0_i32_1 = arith.constant 0 : i32
    return %c0_i32, %c0_i32_0 : i32, i32
  }
  func.func @transform_4(%arg0: i32, %arg1: i32, %arg2: i32) -> (i32, i32) {
    %c0_i32 = arith.constant 0 : i32
    %c0_i32_0 = arith.constant 0 : i32
    %c0_i32_1 = arith.constant 0 : i32
    return %c0_i32, %c0_i32_0 : i32, i32
  }
  func.func @transform_5(%arg0: i32, %arg1: i32, %arg2: i32) -> (i32, i32) {
    %c0_i32 = arith.constant 0 : i32
    %c0_i32_0 = arith.constant 0 : i32
    %c0_i32_1 = arith.constant 0 : i32
    return %c0_i32, %c0_i32_0 : i32, i32
  }
  func.func @transform_6(%arg0: i32, %arg1: i32, %arg2: i32) -> (i32, i32) {
    %c0_i32 = arith.constant 0 : i32
    %c0_i32_0 = arith.constant 0 : i32
    %c0_i32_1 = arith.constant 0 : i32
    return %c0_i32, %c0_i32_0 : i32, i32
  }
  func.func @transform_7(%arg0: i32, %arg1: i32, %arg2: i32) -> (i32, i32) {
    %c0_i32 = arith.constant 0 : i32
    %c0_i32_0 = arith.constant 0 : i32
    %c0_i32_1 = arith.constant 0 : i32
    return %c0_i32, %c0_i32_0 : i32, i32
  }
  func.func @transform_8(%arg0: i32, %arg1: i32, %arg2: i32) -> (i32, i32) {
    %c0_i32 = arith.constant 0 : i32
    %c0_i32_0 = arith.constant 0 : i32
    %c0_i32_1 = arith.constant 0 : i32
    return %c0_i32, %c0_i32_0 : i32, i32
  }
  func.func @transform_9(%arg0: i32, %arg1: i32, %arg2: i32) -> (i32, i32) {
    %c0_i32 = arith.constant 0 : i32
    %c0_i32_0 = arith.constant 0 : i32
    %c0_i32_1 = arith.constant 0 : i32
    return %c0_i32, %c0_i32_0 : i32, i32
  }
  func.func @transform_10(%arg0: i32, %arg1: i32, %arg2: i32) -> (i32, i32, i32) {
    %c0_i32 = arith.constant 0 : i32
    %c0_i32_0 = arith.constant 0 : i32
    return %arg0, %arg1, %c0_i32 : i32, i32, i32
  }
}

</mosaic_0001>

<bundles_post_ra>
// kernel: tpu_custom_call.1
= control target key start
LH: loop header
LB: loop body
LE: loop exit
PB: predicated region body
PF: predicated region fallthrough
CT: control target
= control target key end

     0   :  { %s1221_s0 = inlined_call_operand.vmem [shape: f32[2,16,5], index: 0, kind: input, shape index: {}]   ;;  %s1222_s1 = inlined_call_operand.vmem [shape: f32[2,32,5], index: 1, kind: input, shape index: {}]   ;;  %s1223_s2 = inlined_call_operand.vmem [shape: f32[2,32,4], index: 2, kind: input, shape index: {}]   ;;  %s1224_s3 = inlined_call_operand.vmem [shape: f32[4,8], index: 3, kind: input, shape index: {}]   ;;  %s1225_s4 = inlined_call_operand.vmem [shape: f32[1,8], index: 4, kind: input, shape index: {}]   ;;  %s1226_s5 = inlined_call_operand.vmem [shape: f32[1,8], index: 5, kind: input, shape index: {}]   ;;  %s1227_s6 = inlined_call_operand.vmem [shape: f32[8,16], index: 6, kind: input, shape index: {}]   ;;  %s1228_s7 = inlined_call_operand.vmem [shape: f32[1,16], index: 7, kind: input, shape index: {}]   ;;  %s1229_s8 = inlined_call_operand.vmem [shape: f32[1,16], index: 8, kind: input, shape index: {}]   ;;  %s1230_s9 = inlined_call_operand.vmem [shape: f32[1,16], index: 9, kind: input, shape index: {}]   ;;  %s1231_s10 = inlined_call_operand.hbm [shape: f32[2,16,16], index: 10, kind: output, shape index: {}]  }
   0x1   :  { %1232 = sst [smem:[#allocation7_spill]] %s1221_s0 }
   0x2   :  { %1233 = sst [smem:[#allocation8_spill]] %s1222_s1 }
   0x3   :  { %15 = vsyncpa [#allocation5], 0 }
   0x4   :  { %17 = vsyncpa [#allocation5 + $0x1], 0  ;;  %s1087_s13 = smov 0   ;;  %s1089_s14 = smov 0  }
   0x5   :  { %s1091_s15 = smov 0   ;;  %s1093_s16 = smov 0  }
   0x6   :  { %s1095_s17 = smov 0   ;;  %s1097_s18 = smov 0  }
   0x7 LB: > { %s841_s19 = sadd.s32 4294967295, %s1026_s18   ;;  %s842_s20 = sadd.s32 4294967294, %s1026_s18   ;;  %s1026_s18 = sphi %s1097_s18, %s23_s18   ;;  %s1022_s17 = sphi %s1095_s17, %s1242_s17   ;;  %s1018_s16 = sphi %s1093_s16, %s1241_s16   ;;  %s1014_s15 = sphi %s1091_s15, %s1240_s15   ;;  %s1010_s14 = sphi %s1089_s14, %s1239_s14   ;;  %s1006_s13 = sphi %s1087_s13, %s1238_s13  }
   0x8   : > { %s42_s21 = sadd.s32 1, %s1022_s17  ;;  %s282_s22 = sadd.s32 1, %s1014_s15 }
   0x9   : > { %p44_p0 = scmp.ge.s32.totalorder %s42_s21, 2  ;;  %p292_p1 = scmp.ne.s32.totalorder %s1014_s15, %s1010_s14 }
   0xa   : > { %p293_p2 = scmp.eq.s32.totalorder %s841_s19, 1  ;;  %p298_p3 = scmp.ne.s32.totalorder %s1010_s14, %s1006_s13 }
   0xb   : > { %s1244_s21 = smov (%p44_p0, %s42_s21), 0  ;;  %p299_p5 = scmp.eq.s32.totalorder %s842_s20, 1 }
   0xc   : > { %p1127_p4 = por %p293_p2, %p292_p1  ;;  %s277_s24 = ssub.s32 %s1022_s17, %s1244_s21 }
   0xd   : > { %p845_p6 = scmp.ge.s32.totalorder %s1026_s18, 1  ;;  %p280_p7 = scmp.eq.s32.totalorder %s277_s24, 0 }
   0xe   : > { %p1134_p8 = por %p299_p5, %p298_p3  ;;  %p377_p9 = scmp.lt.s32.totalorder %s1026_s18, 3 }
   0xf   : > { %s1140_s26 = scalar_select %p280_p7, %s1014_s15, %s282_s22  }
  0x10   : > { %p378_p10 = pnand %p845_p6, %p377_p9 }
  0x11   : > { %p438_p11 = scmp.lt.s32.totalorder (!%p378_p10), %s1018_s16, 1  ;;  %s1236_s1 = sld [smem:[#allocation8_spill]] (!%p378_p10) }
  0x12   : > { %381 = sbr.rel (%p378_p10) target bundleno = 724 (0x2d4), region = 60  ;;  %s1237_s0 = sld [smem:[#allocation7_spill]] (!%p378_p10) }
  0x13   : > { %s968_s24 = scalar_lea.hbm (!%p378_p10), %s1231_s10, 32 }
  0x17   : > { %s439_s27 = scalar_select %p438_p11, %s1018_s16, 1  ;;  %vm485_vm0 = vcmask 39936   ;;  %vm476_vm1 = vcmask 7168   ;;  %v1028_v12 = vmov 0.0   ;;  %vm539_vm2 = vcmask 261120   ;;  %v653_v52 = vld [vmem:[%s1227_s6] sm:$0xff] }
  0x18   : > { %477 = vst.msk [vmem:[#allocation3] sm:$0xff] %vm476_vm1, %v1028_v12  ;;  %vm473_vm5 = vcmask 31744   ;;  %v1029_v26 = vmov 0   ;;  %v605_v45 = vld [vmem:[%s1224_s3] sm:$0xf]  ;;  %vm612_vm6 = vcmask 1043456   ;;  %680 = vmatpush.msra.mxu3 %v653_v52 }
  0x19   : > { %s871_s28 = sshll.u32 %s439_s27, 5  ;;  %s870_s12 = sshll.u32 %s439_s27, 4  ;;  %478 = vst.msk [vmem:[#allocation3 + $0x8] sm:$0xff] %vm476_vm1, %v1028_v12  ;;  %933 = vset.pattern.permute.xlu1 %v1029_v26  ;;  %934 = vset.pattern.permute.xlu0 %v1029_v26  ;;  %v935_v53 = vld [vmem:[%s1225_s4] ss:$0 sm:$0xff]  ;;  %vm658_vm7 = vcmask 64512  }
  0x1a   : > { %s455_s11 = scalar_lea.vmem %s1236_s1, %s871_s28  ;;  %s445_s22 = scalar_lea.vmem %s1237_s0, %s870_s12  ;;  %474 = vst.msk [vmem:[#allocation2] sm:$0xff] %vm473_vm5, %v1028_v12  ;;  %860 = vmatpush.msk.msra.mxu2 %vm612_vm6, %v605_v45  ;;  %v936_v54 = vld [vmem:[%s1226_s5] ss:$0 sm:$0xff]  ;;  %vm702_vm8 = vcmask 130048  }
  0x1b   : > { %v484_v0 = vld [vmem:[%s455_s11 + $0x18] sm:$0xff]  ;;  %v483_v1 = vld [vmem:[%s455_s11 + $0x10] sm:$0xff]  ;;  %v482_v2 = vld [vmem:[%s455_s11 + $0x8] sm:$0xff]  ;;  %s465_s30 = scalar_lea.vmem %s1223_s2, %s871_s28  ;;  %475 = vst.msk [vmem:[#allocation2 + $0x8] sm:$0xff] %vm473_vm5, %v1028_v12 }
  0x1c   : > { %853 = vmatpush.xpose.msk.msra.mxu0 %vm485_vm0, %v484_v0  ;;  %v481_v3 = vld [vmem:[%s455_s11] sm:$0xff]  ;;  %v480_v5 = vld [vmem:[%s445_s22 + $0x8] sm:$0xff]  ;;  %v556_v6 = vld [vmem:[%s465_s30 + $0x10] sm:$0xff]  ;;  %s434_s11 = sand.u32 1, %s1010_s14  }
  0x1d   : > { %v479_v4 = vld [vmem:[%s445_s22] sm:$0xff]  ;;  %v557_v7 = vld [vmem:[%s465_s30 + $0x18] sm:$0xff]  ;;  %v555_v10 = vld [vmem:[%s465_s30 + $0x8] sm:$0xff]  ;;  %s846_s20 = sshll.u32 %s434_s11, 4  ;;  %s873_s22 = sshll.u32 %s1018_s16, 4 }
  0x1e   : > { %v559_v8 = vpack.c.bf16 %v557_v7, %v556_v6  ;;  %v554_v9 = vld [vmem:[%s465_s30] sm:$0xff]  ;;  %s719_s30 = scalar_lea.hbm %s1231_s10, %s873_s22  ;;  %s436_s27 = scalar_lea.vmem [#allocation4], %s846_s20 }
  0x1f   : > { %v558_v11 = vpack.c.bf16 %v555_v10, %v554_v9  ;;  %v537_v27 = vld [vmem:[#allocation3] sm:$0xff]  ;;  %v937_v63 = vld [vmem:[%s1228_s7] ss:$0 sm:$0xff]  ;;  %s720_s28 = sshll.u32 %s436_s27, 4  ;;  %s722_s0 = sshll.u32 %s719_s30, 4  ;;  %s721_s28 = int_to_ptr.vmem [resolvable:$true] %s720_s28  ;;  %s723_s0 = int_to_ptr.hbm [resolvable:$true] %s722_s0 }
  0x20   : > { %854 = vmatpush.xpose.msk.msra.mxu0 %vm485_vm0, %v483_v1  ;;  %569 = vmatpush.bf16.msra.mxu1 %v559_v8  ;;  %v538_v30 = vld [vmem:[#allocation3 + $0x8] sm:$0xff]  ;;  %v938_v0 = vld [vmem:[%s1229_s8] ss:$0 sm:$0xff]  ;;  %s706_s16 = scalar_lea.sflag [#allocation5], %s434_s11  ;;  %s962_s12 = sshra.s32 %s723_s0, 4  ;;  %s963_s12 = int_to_ptr.hbm [resolvable:$true] %s962_s12 }
  0x21   : > { %v551_v35 = vld [vmem:[#allocation2] sm:$0xff]  ;;  %s964_s19 = scalar_lea.hbm %s963_s12, 16  ;;  %p969_p1 = scmp.lt.s32.totalorder %s963_s12, %s1231_s10 }
  0x22   : > { %v552_v41 = vld [vmem:[#allocation2 + $0x8] sm:$0xff]  ;;  %p965_p12 = scmp.ne.s32.totalorder %s963_s12, %s964_s19  ;;  %p970_p2 = scmp.lt.s32.totalorder %s968_s24, %s964_s19 }
  0x24   : > { %855 = vmatpush.xpose.msk.msra.mxu0 %vm485_vm0, %v482_v2  ;;  %570 = vmatpush.bf16.msra.mxu1 %v558_v11  ;;  %p966_p13 = pnand %p965_p12, %p1127_p4  ;;  %p971_p3 = por %p970_p2, %p969_p1 }
  0x26   : > { %p967_p0 = pneg %p966_p13 }
  0x28   : > { %856 = vmatpush.xpose.msk.msra.mxu0 %vm485_vm0, %v481_v3  ;;  %v939_v3 = vld [vmem:[%s1230_s9] ss:$0 sm:$0xff]  ;;  %p972_p5 = pnand %p971_p3, %p967_p0 }
  0x2b   : > { %857 = vmatmul.msk.f32.vlgmr.msra.gmra.mxu0 %vm485_vm0, %v479_v4 }
  0x33   : > { %858 = vmatmul.msk.f32.gmra.mxu0 %vm485_vm0, %v480_v5 }
  0xa8   : > { %v521_v13 = vpop.f32.mrf.mxu0 }
  0xa9   : > { %v527_v14 = vmul.f32 -312.5, %v521_v13  ;;  %vm533_vm3 = vcmp.le.f32.partialorder %v521_v13, 0.04 }
  0xab   : > { %v529_v15 = vmul.f32 1.442695, %v527_v14 }
  0xad   : > { %940 = vpow2.f32 %v529_v15 }
  0xb0   : > { %v524_v16 = vpop.f32.mrf.mxu0 }
  0xb1   : > { %v528_v17 = vmul.f32 -312.5, %v524_v16  ;;  %vm534_vm4 = vcmp.le.f32.partialorder %v524_v16, 0.04 }
  0xb3   : > { %v941_v18 = vpop.eup %940  ;;  %v531_v19 = vmul.f32 1.442695, %v528_v17 }
  0xb4   : > { %v535_v20 = vsel %vm533_vm3, %v941_v18, 0.0 }
  0xb5   : > { %942 = vpow2.f32 %v531_v19  ;;  %v540_v21 = vsel %vm539_vm2, %v535_v20, 0.0 }
  0xb6   : > { %541 = vadd.xlane.f32.xlu0 %v540_v21 }
  0xbb   : > { %v943_v22 = vpop.eup %942 }
  0xbc   : > { %v536_v23 = vsel %vm534_vm4, %v943_v22, 0.0 }
  0xbd   : > { %v543_v24 = vsel %vm539_vm2, %v536_v23, 0.0  ;;  %v553_v25 = vpack.c.bf16 %v536_v23, %v535_v20 }
  0xbe   : > { %544 = vadd.xlane.f32.xlu0 %v543_v24 }
  0xbf   : > { %859 = vmatmul.msk.bf16.vlgmr.msra.gmra.mxu1 %vm539_vm2, %v553_v25 }
 0x129   : > { %v542_v28 = vpop.xlane.xlu0 %541 }
 0x12a   : > { %v546_v29 = vadd.f32 %v542_v28, %v537_v27 }
 0x12c   : > { %549 = vst.msk [vmem:[#allocation3] sm:$0xff] %vm476_vm1, %v546_v29 }
 0x131   : > { %v545_v31 = vpop.xlane.xlu0 %544 }
 0x132   : > { %v547_v32 = vadd.f32 %v545_v31, %v538_v30 }
 0x133   : > { %v585_v33 = vld [vmem:[#allocation3] sm:$0xff] }
 0x134   : > { %550 = vst.msk [vmem:[#allocation3 + $0x8] sm:$0xff] %vm476_vm1, %v547_v32  ;;  %v587_v34 = vadd.f32 1e-08, %v585_v33 }
 0x136   : > { %944 = vrcp.f32 %v587_v34 }
 0x13b   : > { %v586_v36 = vld [vmem:[#allocation3 + $0x8] sm:$0xff] }
 0x13c   : > { %v945_v37 = vpop.eup %944  ;;  %v572_v38 = vpop.f32.mrf.mxu1  ;;  %v588_v39 = vadd.f32 1e-08, %v586_v36 }
 0x13d   : > { %v577_v40 = vadd.f32 %v572_v38, %v551_v35  ;;  %595 = vperm.xlu1 %933, %v945_v37  }
 0x13e   : > { %946 = vrcp.f32 %v588_v39 }
 0x13f   : > { %580 = vst.msk [vmem:[#allocation2] sm:$0xff] %vm473_vm5, %v577_v40 }
 0x144   : > { %v947_v42 = vpop.eup %946  ;;  %v574_v43 = vpop.f32.mrf.mxu1 }
 0x145   : > { %v578_v44 = vadd.f32 %v574_v43, %v552_v41  ;;  %600 = vperm.xlu1 %933, %v947_v42  }
 0x146   : > { %v591_v47 = vld [vmem:[#allocation2] sm:$0xff] }
 0x147   : > { %581 = vst.msk [vmem:[#allocation2 + $0x8] sm:$0xff] %vm473_vm5, %v578_v44 }
 0x14e   : > { %v592_v49 = vld [vmem:[#allocation2 + $0x8] sm:$0xff] }
 0x1af   : > { %v596_v46 = vpop.permute.xlu1 %595 }
 0x1b0   : > { %v603_v48 = vmul.f32 %v596_v46, %v591_v47 }
 0x1b2   : > { %861 = vmatmul.msk.f32.vlgmr.msra.gmra.mxu2 %vm473_vm5, %v603_v48 }
 0x1b7   : > { %v601_v50 = vpop.permute.xlu1 %600 }
 0x1b8   : > { %v604_v51 = vmul.f32 %v601_v50, %v592_v49 }
 0x1ba   : > { %862 = vmatmul.msk.f32.gmra.mxu2 %vm473_vm5, %v604_v51 }
 0x235   : > { %v633_v55 = vpop.f32.mrf.mxu2 }
 0x236   : > { %v643_v56 = vmul.f32 %v935_v53, %v633_v55 }
 0x238   : > { %v649_v57 = vadd.f32 %v936_v54, %v643_v56 }
 0x23a   : > { %v651_v58 = vmax.f32 %v649_v57, 0.0 }
 0x23c   : > { %863 = vmatmul.msk.f32.vlgmr.msra.gmra.mxu3 %vm658_vm7, %v651_v58 }
 0x23d   : > { %v636_v59 = vpop.f32.mrf.mxu2 }
 0x23e   : > { %v644_v60 = vmul.f32 %v935_v53, %v636_v59 }
 0x240   : > { %v650_v61 = vadd.f32 %v936_v54, %v644_v60 }
 0x242   : > { %v652_v62 = vmax.f32 %v650_v61, 0.0 }
 0x244   : > { %864 = vmatmul.msk.f32.gmra.mxu3 %vm658_vm7, %v652_v62 }
 0x2bf   : > { %v682_v1 = vpop.f32.mrf.mxu3 }
 0x2c0   : > { %v683_v2 = vadd.f32 %v937_v63, %v682_v1 }
 0x2c2   : > { %v692_v4 = vmul.f32 %v938_v0, %v683_v2 }
 0x2c4   : > { %v698_v5 = vadd.f32 %v939_v3, %v692_v4 }
 0x2c6   : > { %v700_v6 = vmax.f32 %v698_v5, 0.0 }
 0x2c7   : > { %v685_v7 = vpop.f32.mrf.mxu3 }
 0x2c8   : > { %703 = vst.msk [vmem:[%s436_s27] sm:$0xff] %vm702_vm8, %v700_v6  ;;  %v686_v8 = vadd.f32 %v937_v63, %v685_v7 }
 0x2ca   : > { %v693_v9 = vmul.f32 %v938_v0, %v686_v8 }
 0x2cc   : > { %v699_v10 = vadd.f32 %v939_v3, %v693_v9 }
 0x2ce   : > { %v701_v11 = vmax.f32 %v699_v10, 0.0 }
 0x2d0   : > { %704 = vst.msk [vmem:[%s436_s27 + $0x8] sm:$0xff] %vm702_vm8, %v701_v11 }
 0x2d1   : > { %975 = shalt.err (!%p972_p5)
}
 0x2d2   : > { %s1030_s11 = smov 128   ;;  %s1031_s30 = smov 8  }
 0x2d3   : > { %874 = dma.vmem_to_hbm [thread:$0]  (%p1127_p4), %s721_s28, 256, %s723_s0, %s706_s16, %s1030_s11, %s1030_s11, %s1031_s30  }
 0x2d4 PF: > { %p880_p6 = scmp.ge.s32.totalorder %s1026_s18, 2  ;;  %s737_s27 = sand.u32 1, %s1006_s13  }
 0x2d5   : > { %s738_s1 = scalar_lea.sflag [#allocation5], %s737_s27 }
 0x2d6   : > { %p877_p7 = pnand %p880_p6, %p1134_p8 }
 0x2d8   : > { %p878_p9 = pneg %p877_p7 }
 0x2da   : > { %1001 = dma.done.wait (%p878_p9), %s738_s1, 256  }
 0x2db   : > { %1003 = vsyncadd (%p878_p9), %s738_s1, 4294967040  ;;  %s23_s18 = sadd.s32 1, %s1026_s18   ;;  %s1238_s13 = smov %s1010_s14 }
 0x2dc   : > { %p20_p10 = scmp.ge.s32.totalorder %s23_s18, 4   ;;  %s1239_s14 = smov %s1014_s15 }
 0x2dd   : > { %s1240_s15 = smov %s1140_s26  ;;  %s1241_s16 = smov %s1022_s17 }
 0x2de   : > { %s1242_s17 = smov %s1244_s21  ;;  %22 = sbr.rel (!%p20_p10) target bundleno = 7 (0x7), region = 109 }
 0x2e3   :  { %744 = vsyncpa [#allocation5], 1 }
 0x2e4   :  { %746 = vsyncpa [#allocation5 + $0x1], 1 }

</bundles_post_ra>
